<compile_context>
chip_gen: v7x
topology: tpu7x:2x2x1
jax: 0.10.0
libtpu: 0.0.40
codegen_flags: <defaults>
</compile_context>

<pallas_src>
import jax
import jax.numpy as jnp
from jax.experimental import pallas as pl
from jax.experimental.pallas import tpu as pltpu


def _l2_normalize_kernel(x_ref, o_ref):
    # One (tile_b, D) block per grid step; the full feature axis is resident so
    # the per-row reduction is a single lane-axis (XLU) sum.
    x = x_ref[...]
    xf = x.astype(jnp.float32)
    sq_sum = jnp.sum(xf * xf, axis=-1, keepdims=True)     # (tile_b, 1)  -> XLU
    inv_norm = jax.lax.rsqrt(sq_sum)                       # 1/||x||_2    -> EUP
    # Multiply in the native dtype (no full-tile f32 intermediate for bf16/fp8).
    o_ref[...] = (x * inv_norm.astype(x.dtype)).astype(o_ref.dtype)


def _round_up(a: int, m: int) -> int:
    return ((a + m - 1) // m) * m


def _tile_byte_budget(itemsize: int) -> int:
    # 4 pipeline buffers (in + out, double-buffered) x 4 MiB = 16 MiB, backed by
    # an explicit 32 MiB vmem limit (safe on all generations: v5e/v6e 128 MiB
    # physical, v7x 64 MiB physical).  Halve for narrow dtypes so the f32
    # squared-sum intermediate doesn't silently blow the budget.
    budget = 4 << 20
    if itemsize < 4:
        budget //= 2
    return budget


def _choose_tile_b(B: int, D: int, itemsize: int, sublane: int,
                   tile_bytes: int, *, min_steps: int = 8,
                   min_tile_bytes: int = 1 << 20) -> int:
    row_bytes = max(D * itemsize, 1)
    # Largest row count within the per-tile byte budget.
    rows_budget = max(tile_bytes // row_bytes, 1)
    # Prefer >= min_steps grid steps (keeps the software pipeline overlapped and
    # gives each v7x TensorCore several tiles), but never shrink a tile below
    # ~min_tile_bytes: per-step overhead (~0.35 us) stays negligible there.
    rows_floor = max(min_tile_bytes // row_bytes, 1)
    rows_steps = max(pl.cdiv(B, min_steps), 1)
    rows = min(rows_budget, max(rows_steps, rows_floor))
    rows = max((rows // sublane) * sublane, sublane)

    if B <= sublane:
        return B  # single full-dim block (exemption to the sublane rule)
    tile_b = min(rows, (B // sublane) * sublane)

    # Bias toward an even step count: on v7x the "parallel" batch axis is split
    # across two TensorCores and an odd count leaves one idle for the last tile.
    steps = pl.cdiv(B, tile_b)
    if steps > 1 and steps % 2 == 1:
        cand = max((pl.cdiv(B, steps + 1) // sublane) * sublane, sublane)
        if pl.cdiv(B, cand) % 2 == 0:
            tile_b = cand
    return tile_b


def normalize(x: jax.Array) -> jax.Array:
    """L2-normalize x (B, D) along axis 1: x / ||x||_2 (no eps, like the module)."""
    assert x.ndim == 2, "Normalize kernel expects (batch, features)"
    B, D = x.shape
    dtype = x.dtype
    itemsize = jnp.dtype(dtype).itemsize
    sublane = max(8, 32 // itemsize)          # 8 (f32) / 16 (bf16) / 32 (int8, fp8)

    # TODO(synk): for extreme D (a single (sublane, D) stripe x 4 pipeline
    # buffers exceeding scoped VMEM, hit first on v7x) add a second grid axis
    # over D with a partial-sum scratch and a two-pass divide.
    tile_b = _choose_tile_b(B, D, itemsize, sublane, _tile_byte_budget(itemsize))

    grid = (pl.cdiv(B, tile_b),)
    return pl.pallas_call(
        _l2_normalize_kernel,
        out_shape=jax.ShapeDtypeStruct((B, D), dtype),
        grid_spec=pl.GridSpec(
            grid=grid,
            in_specs=[pl.BlockSpec((tile_b, D), lambda i: (i, 0))],
            out_specs=pl.BlockSpec((tile_b, D), lambda i: (i, 0)),
        ),
        compiler_params=pltpu.CompilerParams(
            dimension_semantics=("parallel",),
            vmem_limit_bytes=32 << 20,
        ),
    )(x)


if __name__ == "__main__":
    def _ref(a):
        return a / jnp.linalg.norm(a, ord=2, axis=1, keepdims=True)

    # Case 1: aligned (batch, features) — the canonical vqa.py usage.
    x1 = jax.random.normal(jax.random.PRNGKey(0), (64, 128), dtype=jnp.float32)
    y1 = normalize(x1)
    jax.block_until_ready(y1)
    assert jnp.allclose(y1, _ref(x1), atol=1e-5, rtol=1e-5), "mismatch (aligned)"

    # Case 2: unaligned batch & features (ragged last block + masked lane stores,
    # no pad/slice HBM passes anymore).
    x2 = jax.random.normal(jax.random.PRNGKey(1), (10, 96), dtype=jnp.float32)
    y2 = normalize(x2)
    jax.block_until_ready(y2)
    assert jnp.allclose(y2, _ref(x2), atol=1e-5, rtol=1e-5), "mismatch (unaligned)"

    # Case 3: multi-step grid with a ragged tail block (exercises the pipeline
    # index map and boundary-block write masking on the default tiling path).
    x3 = jax.random.normal(jax.random.PRNGKey(2), (4100, 512), dtype=jnp.float32)
    y3 = normalize(x3)
    jax.block_until_ready(y3)
    assert jnp.allclose(y3, _ref(x3), atol=1e-5, rtol=1e-5), "mismatch (multi-step)"

    print("KERNEL_OK")
</pallas_src>

<mosaic_0001>
module attributes {stable_mosaic.version = 11 : i64} {
  func.func @_l2_normalize_kernel(%arg0: i32, %arg1: memref<64x128xf32, #tpu.memory_space<vmem>>, %arg2: memref<64x128xf32, #tpu.memory_space<vmem>>) attributes {dimension_semantics = [#tpu.dimension_semantics<parallel>], iteration_bounds = array<i64: 1>, scalar_prefetch = 0 : i64, scratch_operands = 0 : i64, tpu.core_type = #tpu.core_type<tc>, window_params = [{transform_indices = @transform_0, window_bounds = array<i64: 64, 128>}, {transform_indices = @transform_1, window_bounds = array<i64: 64, 128>}]} {
    %c0 = arith.constant 0 : index
    %c0_0 = arith.constant 0 : index
    %0 = vector.load %arg1[%c0, %c0_0] : memref<64x128xf32, #tpu.memory_space<vmem>>, vector<64x128xf32>
    %1 = arith.mulf %0, %0 : vector<64x128xf32>
    %cst = arith.constant dense<0.000000e+00> : vector<64xf32>
    %2 = vector.multi_reduction <add>, %1, %cst [1] : vector<64x128xf32> to vector<64xf32>
    %3 = vector.shape_cast %2 : vector<64xf32> to vector<64x1xf32>
    %4 = math.rsqrt %3 : vector<64x1xf32>
    %5 = vector.broadcast %4 : vector<64x1xf32> to vector<64x128xf32>
    %6 = arith.mulf %0, %5 : vector<64x128xf32>
    %c0_1 = arith.constant 0 : index
    %c0_2 = arith.constant 0 : index
    %7 = vector.load %arg2[%c0_1, %c0_2] : memref<64x128xf32, #tpu.memory_space<vmem>>, vector<64x128xf32>
    tpu.vector_store %arg2[%c0_1, %c0_2], %6 {strides = array<i32>} : memref<64x128xf32, #tpu.memory_space<vmem>>, vector<64x128xf32>,
    return
  }
  func.func @transform_0(%arg0: i32) -> (i32, i32) {
    %c0_i32 = arith.constant 0 : i32
    %c0_i32_0 = arith.constant 0 : i32
    return %arg0, %c0_i32 : i32, i32
  }
  func.func @transform_1(%arg0: i32) -> (i32, i32) {
    %c0_i32 = arith.constant 0 : i32
    %c0_i32_0 = arith.constant 0 : i32
    return %arg0, %c0_i32 : i32, i32
  }
}

</mosaic_0001>

<bundles_post_ra>
// kernel: tpu_custom_call.1
= control target key start
LH: loop header
LB: loop body
LE: loop exit
PB: predicated region body
PF: predicated region fallthrough
CT: control target
= control target key end

     0   :  { %6 = vsyncpa [#allocation3], 0  ;;  %s208_s0 = inlined_call_operand.hbm [shape: f32[64,128], index: 0, kind: input, shape index: {}]   ;;  %s209_s1 = inlined_call_operand.hbm [shape: f32[64,128], index: 1, kind: output, shape index: {}]  }
   0x1   :  { %7 = vsyncpa [#allocation4], 0  ;;  %s164_s6 = smov [#allocation2]   ;;  %s116_s10 = scalar_lea.hbm %s208_s0, 1024 }
   0x2   :  { %s13_s7 = sshll.u32 %s164_s6, 4  ;;  %p117_p0 = scmp.ne.s32.totalorder %s208_s0, %s116_s10  ;;  %s14_s7 = int_to_ptr.vmem [resolvable:$true] %s13_s7 }
   0x3   :  { %p120_p1 = scmp.lt.u32.totalorder %s116_s10, %s208_s0 }
   0x5   :  { %p122_p2 = pnand %p120_p1, %p117_p0 }
   0x7   :  { %125 = shalt.err (!%p122_p2)
}
   0x8   :  { %s126_s15 = scalar_lea.vmem %s14_s7, 1024  ;;  %p131_p4 = scmp.lt.s32.totalorder %s14_s7, %s14_s7 }
   0x9   :  { %p127_p3 = scmp.ne.s32.totalorder %s14_s7, %s126_s15  ;;  %p132_p5 = scmp.lt.s32.totalorder %s126_s15, %s126_s15 }
   0xb   :  { %p133_p6 = por %p132_p5, %p131_p4 }
   0xd   :  { %p134_p7 = pnand %p133_p6, %p127_p3 }
   0xf   :  { %137 = shalt.err (!%p134_p7)
}
  0x10   :  { %s165_s16 = smov 128   ;;  %s166_s17 = smov 8  }
  0x11   :  { %19 = dma.hbm_to_vmem [thread:$0]  %s208_s0, 1024, %s14_s7, [#allocation3], %s165_s16, %s165_s16, %s166_s17  }
  0x12   :  { %160 = dma.done.wait [#allocation3], 1024  }
  0x13   :  { %161 = vsyncadd [#allocation3], 4294966272  ;;  %v25_v0 = vld [vmem:[#allocation2 + $0x10] sm:$0xff]  ;;  %v23_v1 = vld [vmem:[#allocation2] sm:$0xff]  ;;  %s167_s0 = smov [#allocation5]  }
  0x14   :  { %v26_v2 = vld [vmem:[#allocation2 + $0x18] sm:$0xff]  ;;  %v33_v3 = vmul.f32 %v25_v0, %v25_v0  ;;  %v31_v4 = vmul.f32 %v23_v1, %v23_v1  ;;  %v24_v5 = vld [vmem:[#allocation2 + $0x8] sm:$0xff]  ;;  %v27_v9 = vld [vmem:[#allocation2 + $0x20] sm:$0xff]  ;;  %s84_s20 = sshll.u32 %s167_s0, 4  ;;  %s85_s20 = int_to_ptr.vmem [resolvable:$true] %s84_s20 }
  0x15   :  { %v34_v6 = vmul.f32 %v26_v2, %v26_v2  ;;  %v32_v7 = vmul.f32 %v24_v5, %v24_v5  ;;  %v28_v8 = vld [vmem:[#allocation2 + $0x28] sm:$0xff]  ;;  %v35_v11 = vmul.f32 %v27_v9, %v27_v9  ;;  %v30_v12 = vld [vmem:[#allocation2 + $0x38] sm:$0xff]  ;;  %v29_v13 = vld [vmem:[#allocation2 + $0x30] sm:$0xff]  ;;  %s138_s21 = scalar_lea.vmem %s85_s20, 1024  ;;  %p143_p9 = scmp.lt.s32.totalorder %s85_s20, %s85_s20 }
  0x16   :  { %43 = vadd.xlane.f32.xlu1 %v33_v3  ;;  %39 = vadd.xlane.f32.xlu0 %v31_v4  ;;  %v36_v10 = vmul.f32 %v28_v8, %v28_v8  ;;  %v38_v14 = vmul.f32 %v30_v12, %v30_v12  ;;  %v37_v15 = vmul.f32 %v29_v13, %v29_v13  ;;  %p139_p8 = scmp.ne.s32.totalorder %s85_s20, %s138_s21  ;;  %p144_p10 = scmp.lt.s32.totalorder %s138_s21, %s138_s21 }
  0x18   :  { %p145_p11 = por %p144_p10, %p143_p9 }
  0x1a   :  { %45 = vadd.xlane.f32.xlu1 %v34_v6  ;;  %41 = vadd.xlane.f32.xlu0 %v32_v7  ;;  %p146_p12 = pnand %p145_p11, %p139_p8 }
  0x1e   :  { %49 = vadd.xlane.f32.xlu1 %v36_v10  ;;  %47 = vadd.xlane.f32.xlu0 %v35_v11 }
  0x22   :  { %53 = vadd.xlane.f32.xlu1 %v38_v14  ;;  %51 = vadd.xlane.f32.xlu0 %v37_v15 }
  0xa3   :  { %v44_v16 = vpop.xlane.xlu1 %43  ;;  %v40_v17 = vpop.xlane.xlu0 %39 }
  0xa4   :  { %100 = vrsqrt.f32 %v44_v16 }
  0xa5   :  { %102 = vrsqrt.f32 %v40_v17 }
  0xa7   :  { %v46_v18 = vpop.xlane.xlu1 %45  ;;  %v42_v19 = vpop.xlane.xlu0 %41 }
  0xa8   :  { %104 = vrsqrt.f32 %v46_v18 }
  0xa9   :  { %106 = vrsqrt.f32 %v42_v19 }
  0xab   :  { %v50_v20 = vpop.xlane.xlu1 %49  ;;  %v48_v21 = vpop.xlane.xlu0 %47 }
  0xac   :  { %108 = vrsqrt.f32 %v50_v20 }
  0xad   :  { %110 = vrsqrt.f32 %v48_v21 }
  0xae   :  { %v101_v22 = vpop.eup %100 }
  0xaf   :  { %v103_v23 = vpop.eup %102  ;;  %v65_v24 = vmul.f32 %v101_v22, %v25_v0  ;;  %v54_v25 = vpop.xlane.xlu1 %53 }
  0xb0   :  { %v52_v26 = vpop.xlane.xlu0 %51  ;;  %v63_v27 = vmul.f32 %v103_v23, %v23_v1  ;;  %112 = vrsqrt.f32 %v54_v25 }
  0xb1   :  { %73 = vst [vmem:[#allocation5 + $0x10] sm:$0xff] %v65_v24  ;;  %114 = vrsqrt.f32 %v52_v26 }
  0xb2   :  { %v105_v28 = vpop.eup %104  ;;  %71 = vst [vmem:[#allocation5] sm:$0xff] %v63_v27 }
  0xb3   :  { %v107_v29 = vpop.eup %106  ;;  %v66_v30 = vmul.f32 %v105_v28, %v26_v2 }
  0xb4   :  { %v64_v31 = vmul.f32 %v107_v29, %v24_v5 }
  0xb5   :  { %74 = vst [vmem:[#allocation5 + $0x18] sm:$0xff] %v66_v30 }
  0xb6   :  { %v109_v32 = vpop.eup %108  ;;  %72 = vst [vmem:[#allocation5 + $0x8] sm:$0xff] %v64_v31 }
  0xb7   :  { %v111_v33 = vpop.eup %110  ;;  %v68_v34 = vmul.f32 %v109_v32, %v28_v8 }
  0xb8   :  { %v67_v35 = vmul.f32 %v111_v33, %v27_v9 }
  0xb9   :  { %76 = vst [vmem:[#allocation5 + $0x28] sm:$0xff] %v68_v34 }
  0xba   :  { %v113_v36 = vpop.eup %112  ;;  %75 = vst [vmem:[#allocation5 + $0x20] sm:$0xff] %v67_v35 }
  0xbb   :  { %v115_v37 = vpop.eup %114  ;;  %v70_v38 = vmul.f32 %v113_v36, %v30_v12 }
  0xbc   :  { %v69_v39 = vmul.f32 %v115_v37, %v29_v13 }
  0xbd   :  { %78 = vst [vmem:[#allocation5 + $0x38] sm:$0xff] %v70_v38 }
  0xbe   :  { %77 = vst [vmem:[#allocation5 + $0x30] sm:$0xff] %v69_v39 }
  0xbf   :  { %149 = shalt.err (!%p146_p12)
}
  0xc0   :  { %s150_s24 = scalar_lea.hbm %s209_s1, 1024 }
  0xc1   :  { %p151_p13 = scmp.ne.s32.totalorder %s209_s1, %s150_s24  ;;  %p154_p0 = scmp.lt.u32.totalorder %s150_s24, %s209_s1 }
  0xc3   :  { %p156_p1 = pnand %p154_p0, %p151_p13 }
  0xc5   :  { %159 = shalt.err (!%p156_p1)
}
  0xc6   :  { %90 = dma.vmem_to_hbm [thread:$0]  %s85_s20, 1024, %s209_s1, [#allocation4], %s165_s16, %s165_s16, %s166_s17  }
  0xc7   :  { %162 = dma.done.wait [#allocation4], 1024  }
  0xc8   :  { %163 = vsyncadd [#allocation4], 4294966272 }
  0xc9   :  { %94 = vsyncpa [#allocation3], 1 }
  0xca   :  { %95 = vsyncpa [#allocation4], 1 }

</bundles_post_ra>
